<compile_context>
chip_gen: v5e
topology: v5e:2x2
jax: 0.10.0
libtpu: 0.0.40
codegen_flags: <defaults>
</compile_context>

<pallas_src>
import jax
import jax.numpy as jnp
from jax.experimental import pallas as pl
from jax.experimental.pallas import tpu as pltpu


def mlp_kernel(x_ref, lb_ref, ub_ref,
               w0_ref, b0_ref,          # input layer: (NN, 2), (NN, 1)
               wh_ref, bh_ref,          # hidden layers: (4, NN, NN), (4, NN, 1)
               w5_ref, b5_ref,          # output layer: (NN, 1), (1, 1)
               o_ref):
    x = x_ref[...]                      # (2, TB) f32, batch on lanes
    lb = lb_ref[...]                    # (2, 1)
    ub = ub_ref[...]                    # (2, 1)

    # x1 = 2*(x - lb)/(ub - lb) - 1, with the divide hoisted to one (2,1) op.
    scale = 2.0 / (ub - lb)             # (2, 1)
    x1 = (x - lb) * scale - 1.0         # (2, TB)

    # --- Input layer, K=2: two VPU broadcast-FMAs instead of an MXU matmul ---
    w0 = w0_ref[...]                    # (NN, 2)  torch (out, in) layout
    h = (w0[:, 0:1] * x1[0:1, :]
         + w0[:, 1:2] * x1[1:2, :]
         + b0_ref[...])                 # (NN, TB)
    h = jnp.tanh(h)

    # --- Four hidden layers on the MXU (weights packed, statically unrolled) ---
    for j in range(4):
        h = jnp.tanh(
            jnp.dot(wh_ref[j], h, preferred_element_type=jnp.float32)
            + bh_ref[j])                # (NN, TB)

    # --- Output layer, N=1: VPU multiply + sublane reduction (lane-dense out) ---
    out = jnp.sum(w5_ref[...] * h, axis=0, keepdims=True) + b5_ref[...]  # (1, TB)

    o_ref[...] = out.astype(o_ref.dtype)


def net_forward(x, lb, ub, params, *, tb=None):
    """x: (B, 2) f32.  params: list of 6 (W, b) pairs with W shaped (in, out)."""
    B, D = x.shape
    assert D == 2
    if tb is None:
        tb = B if B <= 512 else 512
    assert B % tb == 0 and tb % 128 == 0, "batch tile must be a multiple of 128"
    NN = params[0][0].shape[1]

    # Re-pack parameters into the transposed (lane-dense) kernel layout.
    w0T = params[0][0].T                                   # (NN, 2)
    b0 = params[0][1].reshape(NN, 1)                       # (NN, 1)
    wh = jnp.stack([params[i][0].T for i in range(1, 5)])  # (4, NN, NN)
    bh = jnp.stack([params[i][1].reshape(NN, 1) for i in range(1, 5)])  # (4, NN, 1)
    w5 = params[5][0]                                      # (NN, 1)
    b5 = params[5][1].reshape(1, 1)                        # (1, 1)

    xT = x.T                                               # (2, B), batch on lanes
    lb_col = lb.reshape(2, 1)
    ub_col = ub.reshape(2, 1)

    def full(shape):
        return pl.BlockSpec(shape, lambda i: (0,) * len(shape))

    in_specs = [
        pl.BlockSpec((2, tb), lambda i: (0, i)),   # xT tile
        full((2, 1)),                              # lb
        full((2, 1)),                              # ub
        full((NN, 2)), full((NN, 1)),              # input layer
        full((4, NN, NN)), full((4, NN, 1)),       # packed hidden layers
        full((NN, 1)), full((1, 1)),               # output layer
    ]

    out_flat = pl.pallas_call(
        mlp_kernel,
        out_shape=jax.ShapeDtypeStruct((1, B), jnp.float32),
        grid_spec=pltpu.PrefetchScalarGridSpec(
            num_scalar_prefetch=0,
            grid=(B // tb,),
            in_specs=in_specs,
            out_specs=pl.BlockSpec((1, tb), lambda i: (0, i)),
        ),
        compiler_params=pltpu.CompilerParams(
            dimension_semantics=("parallel",)),
    )(xT, lb_col, ub_col, w0T, b0, wh, bh, w5, b5)

    return out_flat.reshape(B, 1)


def init_params(key, NN):
    """Deterministic init mimicking torch.nn.Linear default (U(-1/sqrt(fan_in), +))."""
    dims = [(2, NN), (NN, NN), (NN, NN), (NN, NN), (NN, NN), (NN, 1)]
    params = []
    for (fan_in, fan_out) in dims:
        key, kw, kb = jax.random.split(key, 3)
        bound = 1.0 / jnp.sqrt(fan_in)
        w = jax.random.uniform(kw, (fan_in, fan_out), jnp.float32, -bound, bound)
        b = jax.random.uniform(kb, (fan_out,), jnp.float32, -bound, bound)
        params.append((w, b))
    return params


def reference_forward(x, lb, ub, params):
    x1 = 2.0 * (x - lb) / (ub - lb) - 1.0
    h = x1
    for i, (w, b) in enumerate(params):
        h = jnp.dot(h, w, precision=jax.lax.Precision.HIGHEST) + b
        if i < len(params) - 1:
            h = jnp.tanh(h)
    return h


if __name__ == "__main__":
    NN = 32          # hidden width
    B = 256          # number of collocation points (batch)

    key = jax.random.PRNGKey(0)
    kx, kp = jax.random.split(key)

    # Helmholtz domain bounds, e.g. [-1, 1] x [-1, 1]
    lb = jnp.array([-1.0, -1.0], dtype=jnp.float32)
    ub = jnp.array([1.0, 1.0], dtype=jnp.float32)

    # Collocation points (x, y) sampled inside the domain.
    x = jax.random.uniform(kx, (B, 2), jnp.float32, minval=-1.0, maxval=1.0)

    params = init_params(kp, NN)

    out = net_forward(x, lb, ub, params)
    out = jax.block_until_ready(out)

    ref = reference_forward(x, lb, ub, params)
    assert out.shape == (B, 1)
    assert jnp.allclose(out, ref, atol=1e-5, rtol=1e-5), float(jnp.max(jnp.abs(out - ref)))

    print("KERNEL_OK")
</pallas_src>

<mosaic_0001>
module attributes {stable_mosaic.version = 11 : i64} {
  func.func @mlp_kernel(%arg0: i32, %arg1: memref<2x256xf32, #tpu.memory_space<vmem>>, %arg2: memref<2x1xf32, #tpu.memory_space<vmem>>, %arg3: memref<2x1xf32, #tpu.memory_space<vmem>>, %arg4: memref<32x2xf32, #tpu.memory_space<vmem>>, %arg5: memref<32x1xf32, #tpu.memory_space<vmem>>, %arg6: memref<4x32x32xf32, #tpu.memory_space<vmem>>, %arg7: memref<4x32x1xf32, #tpu.memory_space<vmem>>, %arg8: memref<32x1xf32, #tpu.memory_space<vmem>>, %arg9: memref<1x1xf32, #tpu.memory_space<vmem>>, %arg10: memref<1x256xf32, #tpu.memory_space<vmem>>) attributes {dimension_semantics = [#tpu.dimension_semantics<parallel>], iteration_bounds = array<i64: 1>, scalar_prefetch = 0 : i64, scratch_operands = 0 : i64, tpu.core_type = #tpu.core_type<tc>, window_params = [{transform_indices = @transform_0, window_bounds = array<i64: 2, 256>}, {pipeline_mode = #tpu.pipeline_mode<synchronous>, transform_indices = @transform_1, window_bounds = array<i64: 2, 1>}, {pipeline_mode = #tpu.pipeline_mode<synchronous>, transform_indices = @transform_2, window_bounds = array<i64: 2, 1>}, {pipeline_mode = #tpu.pipeline_mode<synchronous>, transform_indices = @transform_3, window_bounds = array<i64: 32, 2>}, {pipeline_mode = #tpu.pipeline_mode<synchronous>, transform_indices = @transform_4, window_bounds = array<i64: 32, 1>}, {pipeline_mode = #tpu.pipeline_mode<synchronous>, transform_indices = @transform_5, window_bounds = array<i64: 4, 32, 32>}, {pipeline_mode = #tpu.pipeline_mode<synchronous>, transform_indices = @transform_6, window_bounds = array<i64: 4, 32, 1>}, {pipeline_mode = #tpu.pipeline_mode<synchronous>, transform_indices = @transform_7, window_bounds = array<i64: 32, 1>}, {pipeline_mode = #tpu.pipeline_mode<synchronous>, transform_indices = @transform_8, window_bounds = array<i64: 1, 1>}, {transform_indices = @transform_9, window_bounds = array<i64: 1, 256>}]} {
    %c0 = arith.constant 0 : index
    %c0_0 = arith.constant 0 : index
    %0 = vector.load %arg1[%c0, %c0_0] : memref<2x256xf32, #tpu.memory_space<vmem>>, vector<2x256xf32>
    %c0_1 = arith.constant 0 : index
    %c0_2 = arith.constant 0 : index
    %1 = vector.load %arg2[%c0_1, %c0_2] : memref<2x1xf32, #tpu.memory_space<vmem>>, vector<2x1xf32>
    %c0_3 = arith.constant 0 : index
    %c0_4 = arith.constant 0 : index
    %2 = vector.load %arg3[%c0_3, %c0_4] : memref<2x1xf32, #tpu.memory_space<vmem>>, vector<2x1xf32>
    %3 = arith.subf %2, %1 : vector<2x1xf32>
    %cst = arith.constant 2.000000e+00 : f32
    %4 = vector.broadcast %cst : f32 to vector<2x1xf32>
    %5 = arith.divf %4, %3 : vector<2x1xf32>
    %6 = vector.broadcast %1 : vector<2x1xf32> to vector<2x256xf32>
    %7 = arith.subf %0, %6 : vector<2x256xf32>
    %8 = vector.broadcast %5 : vector<2x1xf32> to vector<2x256xf32>
    %9 = arith.mulf %7, %8 : vector<2x256xf32>
    %cst_5 = arith.constant 1.000000e+00 : f32
    %10 = vector.broadcast %cst_5 : f32 to vector<2x256xf32>
    %11 = arith.subf %9, %10 : vector<2x256xf32>
    %c0_6 = arith.constant 0 : index
    %c0_7 = arith.constant 0 : index
    %12 = vector.load %arg4[%c0_6, %c0_7] : memref<32x2xf32, #tpu.memory_space<vmem>>, vector<32x2xf32>
    %13 = vector.extract_strided_slice %12 {offsets = [0, 0], sizes = [32, 1], strides = [1, 1]} : vector<32x2xf32> to vector<32x1xf32>
    %14 = vector.extract_strided_slice %11 {offsets = [0, 0], sizes = [1, 256], strides = [1, 1]} : vector<2x256xf32> to vector<1x256xf32>
    %15 = vector.broadcast %13 : vector<32x1xf32> to vector<32x256xf32>
    %16 = vector.broadcast %14 : vector<1x256xf32> to vector<32x256xf32>
    %17 = arith.mulf %15, %16 : vector<32x256xf32>
    %18 = vector.extract_strided_slice %12 {offsets = [0, 1], sizes = [32, 1], strides = [1, 1]} : vector<32x2xf32> to vector<32x1xf32>
    %19 = vector.extract_strided_slice %11 {offsets = [1, 0], sizes = [1, 256], strides = [1, 1]} : vector<2x256xf32> to vector<1x256xf32>
    %20 = vector.broadcast %18 : vector<32x1xf32> to vector<32x256xf32>
    %21 = vector.broadcast %19 : vector<1x256xf32> to vector<32x256xf32>
    %22 = arith.mulf %20, %21 : vector<32x256xf32>
    %23 = arith.addf %17, %22 : vector<32x256xf32>
    %c0_8 = arith.constant 0 : index
    %c0_9 = arith.constant 0 : index
    %24 = vector.load %arg5[%c0_8, %c0_9] : memref<32x1xf32, #tpu.memory_space<vmem>>, vector<32x1xf32>
    %25 = vector.broadcast %24 : vector<32x1xf32> to vector<32x256xf32>
    %26 = arith.addf %23, %25 : vector<32x256xf32>
    %27 = math.tanh %26 : vector<32x256xf32>
    %c0_10 = arith.constant 0 : index
    %c0_11 = arith.constant 0 : index
    %c0_12 = arith.constant 0 : index
    %28 = vector.load %arg6[%c0_10, %c0_11, %c0_12] : memref<4x32x32xf32, #tpu.memory_space<vmem>>, vector<1x32x32xf32>
    %29 = vector.shape_cast %28 : vector<1x32x32xf32> to vector<32x32xf32>
    %cst_13 = arith.constant dense<0.000000e+00> : vector<32x256xf32>
    %30 = tpu.matmul %29, %27, %cst_13 {dimension_numbers = #tpu.dot_dimension_numbers<[1], [0], [0], [1], [0, 0, 1, 1], [], []>} : vector<32x32xf32>, vector<32x256xf32>, vector<32x256xf32> -> vector<32x256xf32>
    %c0_14 = arith.constant 0 : index
    %c0_15 = arith.constant 0 : index
    %c0_16 = arith.constant 0 : index
    %31 = vector.load %arg7[%c0_14, %c0_15, %c0_16] : memref<4x32x1xf32, #tpu.memory_space<vmem>>, vector<1x32x1xf32>
    %32 = vector.shape_cast %31 : vector<1x32x1xf32> to vector<32x1xf32>
    %33 = vector.broadcast %32 : vector<32x1xf32> to vector<32x256xf32>
    %34 = arith.addf %30, %33 : vector<32x256xf32>
    %35 = math.tanh %34 : vector<32x256xf32>
    %c1 = arith.constant 1 : index
    %c0_17 = arith.constant 0 : index
    %c0_18 = arith.constant 0 : index
    %36 = vector.load %arg6[%c1, %c0_17, %c0_18] : memref<4x32x32xf32, #tpu.memory_space<vmem>>, vector<1x32x32xf32>
    %37 = vector.shape_cast %36 : vector<1x32x32xf32> to vector<32x32xf32>
    %cst_19 = arith.constant dense<0.000000e+00> : vector<32x256xf32>
    %38 = tpu.matmul %37, %35, %cst_19 {dimension_numbers = #tpu.dot_dimension_numbers<[1], [0], [0], [1], [0, 0, 1, 1], [], []>} : vector<32x32xf32>, vector<32x256xf32>, vector<32x256xf32> -> vector<32x256xf32>
    %c1_20 = arith.constant 1 : index
    %c0_21 = arith.constant 0 : index
    %c0_22 = arith.constant 0 : index
    %39 = vector.load %arg7[%c1_20, %c0_21, %c0_22] : memref<4x32x1xf32, #tpu.memory_space<vmem>>, vector<1x32x1xf32>
    %40 = vector.shape_cast %39 : vector<1x32x1xf32> to vector<32x1xf32>
    %41 = vector.broadcast %40 : vector<32x1xf32> to vector<32x256xf32>
    %42 = arith.addf %38, %41 : vector<32x256xf32>
    %43 = math.tanh %42 : vector<32x256xf32>
    %c2 = arith.constant 2 : index
    %c0_23 = arith.constant 0 : index
    %c0_24 = arith.constant 0 : index
    %44 = vector.load %arg6[%c2, %c0_23, %c0_24] : memref<4x32x32xf32, #tpu.memory_space<vmem>>, vector<1x32x32xf32>
    %45 = vector.shape_cast %44 : vector<1x32x32xf32> to vector<32x32xf32>
    %cst_25 = arith.constant dense<0.000000e+00> : vector<32x256xf32>
    %46 = tpu.matmul %45, %43, %cst_25 {dimension_numbers = #tpu.dot_dimension_numbers<[1], [0], [0], [1], [0, 0, 1, 1], [], []>} : vector<32x32xf32>, vector<32x256xf32>, vector<32x256xf32> -> vector<32x256xf32>
    %c2_26 = arith.constant 2 : index
    %c0_27 = arith.constant 0 : index
    %c0_28 = arith.constant 0 : index
    %47 = vector.load %arg7[%c2_26, %c0_27, %c0_28] : memref<4x32x1xf32, #tpu.memory_space<vmem>>, vector<1x32x1xf32>
    %48 = vector.shape_cast %47 : vector<1x32x1xf32> to vector<32x1xf32>
    %49 = vector.broadcast %48 : vector<32x1xf32> to vector<32x256xf32>
    %50 = arith.addf %46, %49 : vector<32x256xf32>
    %51 = math.tanh %50 : vector<32x256xf32>
    %c3 = arith.constant 3 : index
    %c0_29 = arith.constant 0 : index
    %c0_30 = arith.constant 0 : index
    %52 = vector.load %arg6[%c3, %c0_29, %c0_30] : memref<4x32x32xf32, #tpu.memory_space<vmem>>, vector<1x32x32xf32>
    %53 = vector.shape_cast %52 : vector<1x32x32xf32> to vector<32x32xf32>
    %cst_31 = arith.constant dense<0.000000e+00> : vector<32x256xf32>
    %54 = tpu.matmul %53, %51, %cst_31 {dimension_numbers = #tpu.dot_dimension_numbers<[1], [0], [0], [1], [0, 0, 1, 1], [], []>} : vector<32x32xf32>, vector<32x256xf32>, vector<32x256xf32> -> vector<32x256xf32>
    %c3_32 = arith.constant 3 : index
    %c0_33 = arith.constant 0 : index
    %c0_34 = arith.constant 0 : index
    %55 = vector.load %arg7[%c3_32, %c0_33, %c0_34] : memref<4x32x1xf32, #tpu.memory_space<vmem>>, vector<1x32x1xf32>
    %56 = vector.shape_cast %55 : vector<1x32x1xf32> to vector<32x1xf32>
    %57 = vector.broadcast %56 : vector<32x1xf32> to vector<32x256xf32>
    %58 = arith.addf %54, %57 : vector<32x256xf32>
    %59 = math.tanh %58 : vector<32x256xf32>
    %c0_35 = arith.constant 0 : index
    %c0_36 = arith.constant 0 : index
    %60 = vector.load %arg8[%c0_35, %c0_36] : memref<32x1xf32, #tpu.memory_space<vmem>>, vector<32x1xf32>
    %61 = vector.broadcast %60 : vector<32x1xf32> to vector<32x256xf32>
    %62 = arith.mulf %61, %59 : vector<32x256xf32>
    %cst_37 = arith.constant dense<0.000000e+00> : vector<256xf32>
    %63 = vector.multi_reduction <add>, %62, %cst_37 [0] : vector<32x256xf32> to vector<256xf32>
    %64 = vector.shape_cast %63 : vector<256xf32> to vector<1x256xf32>
    %c0_38 = arith.constant 0 : index
    %c0_39 = arith.constant 0 : index
    %65 = vector.load %arg9[%c0_38, %c0_39] : memref<1x1xf32, #tpu.memory_space<vmem>>, vector<1x1xf32>
    %66 = vector.broadcast %65 : vector<1x1xf32> to vector<1x256xf32>
    %67 = arith.addf %64, %66 : vector<1x256xf32>
    %c0_40 = arith.constant 0 : index
    %c0_41 = arith.constant 0 : index
    %68 = vector.load %arg10[%c0_40, %c0_41] : memref<1x256xf32, #tpu.memory_space<vmem>>, vector<1x256xf32>
    tpu.vector_store %arg10[%c0_40, %c0_41], %67 {strides = array<i32>} : memref<1x256xf32, #tpu.memory_space<vmem>>, vector<1x256xf32>,
    return
  }
  func.func @transform_0(%arg0: i32) -> (i32, i32) {
    %c0_i32 = arith.constant 0 : i32
    %c0_i32_0 = arith.constant 0 : i32
    return %c0_i32, %arg0 : i32, i32
  }
  func.func @transform_1(%arg0: i32) -> (i32, i32) {
    %c0_i32 = arith.constant 0 : i32
    %c0_i32_0 = arith.constant 0 : i32
    %c0_i32_1 = arith.constant 0 : i32
    return %c0_i32, %c0_i32_0 : i32, i32
  }
  func.func @transform_2(%arg0: i32) -> (i32, i32) {
    %c0_i32 = arith.constant 0 : i32
    %c0_i32_0 = arith.constant 0 : i32
    %c0_i32_1 = arith.constant 0 : i32
    return %c0_i32, %c0_i32_0 : i32, i32
  }
  func.func @transform_3(%arg0: i32) -> (i32, i32) {
    %c0_i32 = arith.constant 0 : i32
    %c0_i32_0 = arith.constant 0 : i32
    %c0_i32_1 = arith.constant 0 : i32
    return %c0_i32, %c0_i32_0 : i32, i32
  }
  func.func @transform_4(%arg0: i32) -> (i32, i32) {
    %c0_i32 = arith.constant 0 : i32
    %c0_i32_0 = arith.constant 0 : i32
    %c0_i32_1 = arith.constant 0 : i32
    return %c0_i32, %c0_i32_0 : i32, i32
  }
  func.func @transform_5(%arg0: i32) -> (i32, i32, i32) {
    %c0_i32 = arith.constant 0 : i32
    %c0_i32_0 = arith.constant 0 : i32
    %c0_i32_1 = arith.constant 0 : i32
    %c0_i32_2 = arith.constant 0 : i32
    return %c0_i32, %c0_i32_0, %c0_i32_1 : i32, i32, i32
  }
  func.func @transform_6(%arg0: i32) -> (i32, i32, i32) {
    %c0_i32 = arith.constant 0 : i32
    %c0_i32_0 = arith.constant 0 : i32
    %c0_i32_1 = arith.constant 0 : i32
    %c0_i32_2 = arith.constant 0 : i32
    return %c0_i32, %c0_i32_0, %c0_i32_1 : i32, i32, i32
  }
  func.func @transform_7(%arg0: i32) -> (i32, i32) {
    %c0_i32 = arith.constant 0 : i32
    %c0_i32_0 = arith.constant 0 : i32
    %c0_i32_1 = arith.constant 0 : i32
    return %c0_i32, %c0_i32_0 : i32, i32
  }
  func.func @transform_8(%arg0: i32) -> (i32, i32) {
    %c0_i32 = arith.constant 0 : i32
    %c0_i32_0 = arith.constant 0 : i32
    %c0_i32_1 = arith.constant 0 : i32
    return %c0_i32, %c0_i32_0 : i32, i32
  }
  func.func @transform_9(%arg0: i32) -> (i32, i32) {
    %c0_i32 = arith.constant 0 : i32
    %c0_i32_0 = arith.constant 0 : i32
    return %c0_i32, %arg0 : i32, i32
  }
}

</mosaic_0001>

<bundles_post_ra>
// kernel: tpu_custom_call.1
= control target key start
LH: loop header
LB: loop body
LE: loop exit
PB: predicated region body
PF: predicated region fallthrough
CT: control target
= control target key end

     0   :  { %s1118_s0 = inlined_call_operand.vmem [shape: f32[2,256], index: 0, kind: input, shape index: {}]   ;;  %s1119_s1 = inlined_call_operand.vmem [shape: f32[2,1], index: 1, kind: input, shape index: {}]   ;;  %s1120_s2 = inlined_call_operand.vmem [shape: f32[2,1], index: 2, kind: input, shape index: {}]   ;;  %s1121_s3 = inlined_call_operand.vmem [shape: f32[32,2], index: 3, kind: input, shape index: {}]   ;;  %s1122_s4 = inlined_call_operand.vmem [shape: f32[32,1], index: 4, kind: input, shape index: {}]   ;;  %s1123_s5 = inlined_call_operand.vmem [shape: f32[4,32,32], index: 5, kind: input, shape index: {}]   ;;  %s1124_s6 = inlined_call_operand.vmem [shape: f32[4,32,1], index: 6, kind: input, shape index: {}]   ;;  %s1125_s7 = inlined_call_operand.vmem [shape: f32[32,1], index: 7, kind: input, shape index: {}]   ;;  %s1126_s8 = inlined_call_operand.<no memory space> [shape: f32[1,1], index: 8, kind: input, shape index: {}]   ;;  %s1127_s9 = inlined_call_operand.hbm [shape: f32[1,256], index: 9, kind: output, shape index: {}]  }
   0x1   :  { %v14_v0 = vstv %s1126_s8 }
   0x2   :  { %15 = vst [vmem:[#allocation2] sm:$0x1] %v14_v0 }
   0x3   :  { %v77_v1 = vld [vmem:[%s1121_s3 + $0x10] sm:$0xff]  ;;  %v78_v2 = vld [vmem:[%s1121_s3 + $0x18] sm:$0xff]  ;;  %v36_v3 = vld [vmem:[%s1119_s1] sm:$0x3]  ;;  %v885_v4 = vmov 0  }
   0x4   :  { %773 = vset.pattern.permute.xlu2 %v885_v4  ;;  %771 = vset.pattern.permute.xlu1 %v885_v4  ;;  %v37_v5 = vld [vmem:[%s1120_s2] sm:$0x3] }
   0x5   :  { %91 = vperm.xlu2 %773, %v77_v1   ;;  %96 = vperm.xlu1 %771, %v78_v2   ;;  %v38_v6 = vsub.f32 %v37_v5, %v36_v3 }
   0x6   :  { %16 = vsyncpa [#allocation4], 0  ;;  %770 = vset.pattern.permute.xlu0 %v885_v4  ;;  %v886_v8 = vmov 1   ;;  %v76_v14 = vld [vmem:[%s1121_s3 + $0x8] sm:$0xff]  ;;  %v155_v16 = vld [vmem:[%s1122_s4 + $0x18] sm:$0xff]  ;;  %vm220_vm4 = vcmask 261120  }
   0x7   :  { %56 = vperm.xlu0 %770, %v36_v3   ;;  %777 = vrcp.f32 %v38_v6  ;;  %v50_v10 = vand.u32 2147483648, %v38_v6  ;;  %vm44_vm0 = vweird.f32 %v38_v6  ;;  %v48_v12 = vand.u32 2147483647, %v38_v6  ;;  %v75_v21 = vld [vmem:[%s1121_s3] sm:$0xff]  ;;  %v154_v22 = vld [vmem:[%s1122_s4 + $0x10] sm:$0xff]  ;;  %v199_v23 = vld [vmem:[%s1124_s6 + $0x18] sm:$0xff] }
   0x8   :  { %v152_v24 = vld [vmem:[%s1122_s4] sm:$0xff]  ;;  %v197_v26 = vld [vmem:[%s1124_s6 + $0x8] sm:$0xff]  ;;  %v724_v29 = vld [vmem:[%s1124_s6 + $0x30] sm:$0xff]  ;;  %v887_v48 = vmov 269488144   ;;  %s700_s21 = sshll.u32 %s1127_s9, 4  ;;  %s701_s21 = int_to_ptr.hbm [resolvable:$true] %s700_s21 }
   0x9   :  { %v51_v15 = vor.u32 1.1754944e-38, %v50_v10  ;;  %vm49_vm3 = vcmp.eq.f32.partialorder %v48_v12, 8.507059e+37  ;;  %v196_v25 = vld [vmem:[%s1124_s6] sm:$0xff]  ;;  %v153_v27 = vld [vmem:[%s1122_s4 + $0x8] sm:$0xff]  ;;  %v198_v30 = vld [vmem:[%s1124_s6 + $0x10] sm:$0xff]  ;;  %v59_v49 = vunpack.c.l.s4 %v887_v48  ;;  %vm685_vm5 = vcmask 1040384  }
   0xa   :  { %v723_v28 = vld [vmem:[%s1124_s6 + $0x28] sm:$0xff]  ;;  %v740_v31 = vld [vmem:[%s1124_s6 + $0x50] sm:$0xff]  ;;  %v741_v32 = vld [vmem:[%s1124_s6 + $0x58] sm:$0xff] }
   0xb   :  { %v725_v33 = vld [vmem:[%s1124_s6 + $0x38] sm:$0xff]  ;;  %v754_v34 = vld [vmem:[%s1124_s6 + $0x60] sm:$0xff]  ;;  %v756_v38 = vld [vmem:[%s1124_s6 + $0x70] sm:$0xff]  ;;  %v60_v51 = vunpack.c.0.s8 %v59_v49 }
   0xc   :  { %v738_v35 = vld [vmem:[%s1124_s6 + $0x40] sm:$0xff]  ;;  %v757_v37 = vld [vmem:[%s1124_s6 + $0x78] sm:$0xff]  ;;  %v739_v39 = vld [vmem:[%s1124_s6 + $0x48] sm:$0xff] }
   0xd   :  { %v778_v7 = vpop.eup %777  ;;  %774 = vset.pattern.permute.xlu2 %v886_v8  ;;  %772 = vset.pattern.permute.xlu1 %v886_v8  ;;  %v722_v36 = vld [vmem:[%s1124_s6 + $0x20] sm:$0xff]  ;;  %v625_v40 = vld [vmem:[%s1125_s7 + $0x10] sm:$0xff]  ;;  %v624_v41 = vld [vmem:[%s1125_s7 + $0x8] sm:$0xff] }
   0xe   :  { %123 = vperm.xlu2 %774, %v77_v1   ;;  %127 = vperm.xlu1 %772, %v78_v2   ;;  %v40_v9 = vmul.f32 %v778_v7, %v38_v6  ;;  %vm45_vm1 = vweird.f32 %v778_v7  ;;  %v755_v42 = vld [vmem:[%s1124_s6 + $0x68] sm:$0xff]  ;;  %v673_v43 = vld [vmem:[#allocation2] sm:$0x1]  ;;  %v626_v45 = vld [vmem:[%s1125_s7 + $0x18] sm:$0xff] }
   0xf   :  { %vm46_vm2 = vmor %vm44_vm0, %vm45_vm1  ;;  %v623_v44 = vld [vmem:[%s1125_s7] sm:$0xff] }
  0x10   :  { %v41_v11 = vsub.f32 1.0, %v40_v9  ;;  %v35_v55 = vld [vmem:[%s1118_s0] sm:$0xf] }
  0x12   :  { %v42_v13 = vmul.f32 %v778_v7, %v41_v11 }
  0x14   :  { %v43_v17 = vadd.f32 %v778_v7, %v42_v13 }
  0x16   :  { %775 = vset.pattern.permute.xlu2 %v885_v4  ;;  %119 = vperm.xlu1 %772, %v76_v14   ;;  %v47_v18 = vsel %vm46_vm2, %v778_v7, %v43_v17 }
  0x17   :  { %173 = vperm.xlu2 %775, %v155_v16   ;;  %v52_v19 = vsel %vm49_vm3, %v51_v15, %v47_v18 }
  0x18   :  { %v53_v20 = vmul.f32 2.0, %v52_v19 }
  0x1a   :  { %66 = vperm.xlu0 %770, %v53_v20  }
  0x1e   :  { %115 = vperm.xlu1 %772, %v75_v21  }
  0x1f   :  { %168 = vperm.xlu2 %775, %v154_v22  }
  0x22   :  { %86 = vperm.xlu0 %770, %v76_v14  }
  0x26   :  { %776 = vset.pattern.permute.xlu1 %v885_v4 }
  0x27   :  { %217 = vperm.xlu2 %775, %v199_v23   ;;  %158 = vperm.xlu1 %776, %v152_v24  }
  0x2a   :  { %81 = vperm.xlu0 %770, %v75_v21  }
  0x2f   :  { %202 = vperm.xlu2 %775, %v196_v25   ;;  %207 = vperm.xlu1 %776, %v197_v26  }
  0x32   :  { %163 = vperm.xlu0 %770, %v153_v27  }
  0x37   :  { %316 = vperm.xlu2 %775, %v723_v28   ;;  %321 = vperm.xlu1 %776, %v724_v29  }
  0x3a   :  { %212 = vperm.xlu0 %770, %v198_v30  }
  0x3f   :  { %429 = vperm.xlu2 %775, %v740_v31   ;;  %434 = vperm.xlu1 %776, %v741_v32  }
  0x42   :  { %326 = vperm.xlu0 %770, %v725_v33  }
  0x47   :  { %527 = vperm.xlu2 %775, %v754_v34   ;;  %419 = vperm.xlu1 %776, %v738_v35  }
  0x4a   :  { %311 = vperm.xlu0 %770, %v722_v36  }
  0x4f   :  { %542 = vperm.xlu2 %775, %v757_v37   ;;  %537 = vperm.xlu1 %776, %v756_v38  }
  0x52   :  { %424 = vperm.xlu0 %770, %v739_v39  }
  0x57   :  { %639 = vperm.xlu2 %775, %v625_v40   ;;  %634 = vperm.xlu1 %776, %v624_v41  }
  0x5a   :  { %532 = vperm.xlu0 %770, %v755_v42  }
  0x5f   :  { %676 = vperm.xlu1 %776, %v673_v43   ;;  %v92_v47 = vpop.permute.xlu2 %91 }
  0x62   :  { %629 = vperm.xlu0 %770, %v623_v44  }
  0x68   :  { %v124_v53 = vpop.permute.xlu2 %123 }
  0x6a   :  { %644 = vperm.xlu0 %770, %v626_v45  }
  0x71   :  { %v174_v62 = vpop.permute.xlu2 %173 }
  0x77   :  { %v97_v46 = vpop.permute.xlu1 %96 }
  0x79   :  { %v57_v50 = vpop.permute.xlu0 %56  ;;  %v169_v20 = vpop.permute.xlu2 %168 }
  0x7a   :  { %v61_v54 = vperm.slane %v57_v50, %v60_v51 }
  0x7c   :  { %v63_v57 = vsub.f32 %v35_v55, %v61_v54  ;;  %v193_v54 = vld [vmem:[%s1123_s5 + $0x8] sm:$0xff]  ;;  %v194_v55 = vld [vmem:[%s1123_s5 + $0x10] sm:$0xff] }
  0x80   :  { %v128_v52 = vpop.permute.xlu1 %127 }
  0x88   :  { %v120_v60 = vpop.permute.xlu1 %119 }
  0x8c   :  { %v67_v56 = vpop.permute.xlu0 %66 }
  0x8d   :  { %v71_v58 = vperm.slane %v67_v56, %v60_v51  ;;  %v192_v51 = vld [vmem:[%s1123_s5] sm:$0xff]  ;;  %v195_v56 = vld [vmem:[%s1123_s5 + $0x18] sm:$0xff] }
  0x8f   :  { %v73_v59 = vmul.f32 %v71_v58, %v63_v57 }
  0x90   :  { %v116_v14 = vpop.permute.xlu1 %115 }
  0x91   :  { %v709_v61 = vadd.f32 -1.0, %v73_v59 }
  0x93   :  { %v130_v63 = vperm.slane %v709_v61, 1  ;;  %v131_v0 = vperm.slane %v709_v61, 3  ;;  %v100_v1 = vperm.slane %v709_v61, 0  ;;  %v101_v2 = vperm.slane %v709_v61, 2 }
  0x94   :  { %v87_v3 = vpop.permute.xlu0 %86 }
  0x95   :  { %v134_v4 = vperm.slane %v130_v63, 1  ;;  %v135_v5 = vperm.slane %v131_v0, 1  ;;  %v104_v6 = vperm.slane %v100_v1, 0  ;;  %v105_v7 = vperm.slane %v101_v2, 0  ;;  %v218_v63 = vpop.permute.xlu2 %217 }
  0x97   :  { %v112_v8 = vmul.f32 %v104_v6, %v97_v46  ;;  %v142_v9 = vmul.f32 %v134_v4, %v128_v52  ;;  %v113_v10 = vmul.f32 %v105_v7, %v97_v46  ;;  %v143_v11 = vmul.f32 %v135_v5, %v128_v52 }
  0x98   :  { %v110_v12 = vmul.f32 %v104_v6, %v92_v47  ;;  %v140_v13 = vmul.f32 %v134_v4, %v124_v53  ;;  %v111_v16 = vmul.f32 %v105_v7, %v92_v47  ;;  %v141_v19 = vmul.f32 %v135_v5, %v124_v53 }
  0x99   :  { %v150_v15 = vadd.f32 %v142_v9, %v112_v8  ;;  %v151_v17 = vadd.f32 %v143_v11, %v113_v10  ;;  %v136_v23 = vmul.f32 %v134_v4, %v116_v14  ;;  %v108_v27 = vmul.f32 %v104_v6, %v87_v3  ;;  %v159_v40 = vpop.permute.xlu1 %158 }
  0x9a   :  { %v148_v18 = vadd.f32 %v140_v13, %v110_v12  ;;  %v149_v29 = vadd.f32 %v141_v19, %v111_v16  ;;  %v109_v30 = vmul.f32 %v105_v7, %v87_v3  ;;  %v138_v31 = vmul.f32 %v134_v4, %v120_v60  ;;  %v718_v19 = vld [vmem:[%s1123_s5 + $0x20] sm:$0xff] }
  0x9b   :  { %v182_v22 = vadd.f32 %v174_v62, %v150_v15  ;;  %v183_v25 = vadd.f32 %v174_v62, %v151_v17  ;;  %v139_v32 = vmul.f32 %v135_v5, %v120_v60  ;;  %v137_v33 = vmul.f32 %v135_v5, %v116_v14 }
  0x9c   :  { %v82_v21 = vpop.permute.xlu0 %81  ;;  %v180_v26 = vadd.f32 %v169_v20, %v148_v18  ;;  %v181_v34 = vadd.f32 %v169_v20, %v149_v29  ;;  %v146_v37 = vadd.f32 %v138_v31, %v108_v27 }
  0x9d   :  { %v106_v24 = vmul.f32 %v104_v6, %v82_v21  ;;  %v107_v28 = vmul.f32 %v105_v7, %v82_v21  ;;  %779 = vtanh.f32 %v182_v22  ;;  %v147_v38 = vadd.f32 %v139_v32, %v109_v30  ;;  %v203_v9 = vpop.permute.xlu2 %202  ;;  %v719_v22 = vld [vmem:[%s1123_s5 + $0x28] sm:$0xff] }
  0x9e   :  { %781 = vtanh.f32 %v183_v25 }
  0x9f   :  { %783 = vtanh.f32 %v180_v26  ;;  %v144_v35 = vadd.f32 %v136_v23, %v106_v24  ;;  %v145_v36 = vadd.f32 %v137_v33, %v107_v28  ;;  %v720_v23 = vld [vmem:[%s1123_s5 + $0x30] sm:$0xff]  ;;  %v721_v24 = vld [vmem:[%s1123_s5 + $0x38] sm:$0xff] }
  0xa0   :  { %785 = vtanh.f32 %v181_v34 }
  0xa1   :  { %v176_v43 = vadd.f32 %v159_v40, %v144_v35  ;;  %v177_v47 = vadd.f32 %v159_v40, %v145_v36  ;;  %v208_v5 = vpop.permute.xlu1 %207 }
  0xa3   :  { %v780_v39 = vpop.eup %779 }
  0xa4   :  { %v164_v41 = vpop.permute.xlu0 %163  ;;  %v782_v42 = vpop.eup %781  ;;  %245 = vmatpush.msra.mxu0 %v780_v39 }
  0xa5   :  { %v178_v44 = vadd.f32 %v164_v41, %v146_v37  ;;  %v179_v45 = vadd.f32 %v164_v41, %v147_v38  ;;  %v784_v46 = vpop.eup %783  ;;  %274 = vmatpush.msra.mxu1 %v782_v42  ;;  %v317_v37 = vpop.permute.xlu2 %316 }
  0xa6   :  { %246 = vmatpush.msra.mxu0 %v784_v46  ;;  %v786_v48 = vpop.eup %785 }
  0xa7   :  { %787 = vtanh.f32 %v178_v44  ;;  %275 = vmatpush.msra.mxu1 %v786_v48 }
  0xa8   :  { %789 = vtanh.f32 %v179_v45 }
  0xa9   :  { %791 = vtanh.f32 %v176_v43  ;;  %v322_v32 = vpop.permute.xlu1 %321 }
  0xaa   :  { %793 = vtanh.f32 %v177_v47 }
  0xac   :  { %v213_v0 = vpop.permute.xlu0 %212 }
  0xad   :  { %v788_v49 = vpop.eup %787 }
  0xae   :  { %v790_v50 = vpop.eup %789  ;;  %247 = vmatpush.msra.mxu0 %v788_v49 }
  0xaf   :  { %v792_v52 = vpop.eup %791  ;;  %276 = vmatpush.msra.mxu1 %v790_v50 }
  0xb0   :  { %v794_v53 = vpop.eup %793  ;;  %248 = vmatpush.msra.mxu0 %v792_v52 }
  0xb1   :  { %277 = vmatpush.msra.mxu1 %v794_v53  ;;  %710 = vmatmul.msk.f32.vlgmr.msra.gmra.mxu0 %vm220_vm4, %v192_v51 }
  0xb2   :  { %714 = vmatmul.msk.f32.vlgmr.msra.gmra.mxu1 %vm220_vm4, %v192_v51  ;;  %v734_v51 = vld [vmem:[%s1123_s5 + $0x40] sm:$0xff] }
  0xb4   :  { %v327_v31 = vpop.permute.xlu0 %326 }
  0xb9   :  { %711 = vmatmul.msk.f32.gmra.mxu0 %vm220_vm4, %v193_v54 }
  0xba   :  { %715 = vmatmul.msk.f32.gmra.mxu1 %vm220_vm4, %v193_v54  ;;  %v735_v54 = vld [vmem:[%s1123_s5 + $0x48] sm:$0xff] }
  0xbc   :  { %v312_v41 = vpop.permute.xlu0 %311 }
  0xc1   :  { %712 = vmatmul.msk.f32.gmra.mxu0 %vm220_vm4, %v194_v55 }
  0xc2   :  { %716 = vmatmul.msk.f32.gmra.mxu1 %vm220_vm4, %v194_v55  ;;  %v736_v55 = vld [vmem:[%s1123_s5 + $0x50] sm:$0xff] }
  0xc9   :  { %713 = vmatmul.msk.f32.gmra.mxu0 %vm220_vm4, %v195_v56 }
  0xca   :  { %717 = vmatmul.msk.f32.gmra.mxu1 %vm220_vm4, %v195_v56  ;;  %v737_v56 = vld [vmem:[%s1123_s5 + $0x58] sm:$0xff] }
 0x12e   :  { %v250_v57 = vpop.f32.mrf.mxu0 }
 0x12f   :  { %v279_v58 = vpop.f32.mrf.mxu1  ;;  %v251_v11 = vadd.f32 %v250_v57, %v203_v9 }
 0x130   :  { %v280_v12 = vadd.f32 %v279_v58, %v203_v9 }
 0x136   :  { %v253_v59 = vpop.f32.mrf.mxu0 }
 0x137   :  { %v282_v60 = vpop.f32.mrf.mxu1  ;;  %v254_v8 = vadd.f32 %v253_v59, %v208_v5 }
 0x138   :  { %v283_v10 = vadd.f32 %v282_v60, %v208_v5  ;;  %v425_v5 = vpop.permute.xlu0 %424 }
 0x13e   :  { %v256_v61 = vpop.f32.mrf.mxu0 }
 0x13f   :  { %v285_v62 = vpop.f32.mrf.mxu1  ;;  %v257_v2 = vadd.f32 %v256_v61, %v213_v0 }
 0x140   :  { %v286_v6 = vadd.f32 %v285_v62, %v213_v0  ;;  %v430_v0 = vpop.permute.xlu2 %429 }
 0x146   :  { %v259_v1 = vpop.f32.mrf.mxu0 }
 0x147   :  { %v260_v3 = vadd.f32 %v259_v1, %v218_v63  ;;  %v288_v4 = vpop.f32.mrf.mxu1 }
 0x148   :  { %v289_v7 = vadd.f32 %v288_v4, %v218_v63  ;;  %v435_v63 = vpop.permute.xlu1 %434 }
 0x149   :  { %795 = vtanh.f32 %v260_v3 }
 0x14a   :  { %797 = vtanh.f32 %v289_v7 }
 0x14b   :  { %799 = vtanh.f32 %v257_v2 }
 0x14c   :  { %801 = vtanh.f32 %v286_v6 }
 0x14d   :  { %803 = vtanh.f32 %v254_v8 }
 0x14e   :  { %805 = vtanh.f32 %v283_v10 }
 0x14f   :  { %v796_v13 = vpop.eup %795  ;;  %807 = vtanh.f32 %v251_v11 }
 0x150   :  { %v798_v14 = vpop.eup %797  ;;  %809 = vtanh.f32 %v280_v12  ;;  %353 = vmatpush.msra.mxu2 %v796_v13  ;;  %v420_v9 = vpop.permute.xlu1 %419 }
 0x151   :  { %v800_v15 = vpop.eup %799  ;;  %382 = vmatpush.msra.mxu3 %v798_v14 }
 0x152   :  { %v802_v16 = vpop.eup %801  ;;  %354 = vmatpush.msra.mxu2 %v800_v15 }
 0x153   :  { %v804_v17 = vpop.eup %803  ;;  %383 = vmatpush.msra.mxu3 %v802_v16 }
 0x154   :  { %v806_v18 = vpop.eup %805  ;;  %355 = vmatpush.msra.mxu2 %v804_v17 }
 0x155   :  { %v808_v20 = vpop.eup %807  ;;  %384 = vmatpush.msra.mxu3 %v806_v18 }
 0x156   :  { %v810_v21 = vpop.eup %809  ;;  %356 = vmatpush.msra.mxu2 %v808_v20 }
 0x157   :  { %385 = vmatpush.msra.mxu3 %v810_v21  ;;  %726 = vmatmul.msk.f32.vlgmr.msra.gmra.mxu2 %vm220_vm4, %v718_v19 }
 0x158   :  { %730 = vmatmul.msk.f32.vlgmr.msra.gmra.mxu3 %vm220_vm4, %v718_v19  ;;  %v750_v19 = vld [vmem:[%s1123_s5 + $0x60] sm:$0xff] }
 0x15f   :  { %727 = vmatmul.msk.f32.gmra.mxu2 %vm220_vm4, %v719_v22 }
 0x160   :  { %731 = vmatmul.msk.f32.gmra.mxu3 %vm220_vm4, %v719_v22  ;;  %v751_v22 = vld [vmem:[%s1123_s5 + $0x68] sm:$0xff] }
 0x167   :  { %728 = vmatmul.msk.f32.gmra.mxu2 %vm220_vm4, %v720_v23 }
 0x168   :  { %732 = vmatmul.msk.f32.gmra.mxu3 %vm220_vm4, %v720_v23  ;;  %v752_v23 = vld [vmem:[%s1123_s5 + $0x70] sm:$0xff] }
 0x16f   :  { %729 = vmatmul.msk.f32.gmra.mxu2 %vm220_vm4, %v721_v24 }
 0x170   :  { %733 = vmatmul.msk.f32.gmra.mxu3 %vm220_vm4, %v721_v24  ;;  %v753_v24 = vld [vmem:[%s1123_s5 + $0x78] sm:$0xff]  ;;  %s888_s5 = smov [#allocation3]  }
 0x171   :  { %s698_s8 = sshll.u32 %s888_s5, 4  ;;  %s699_s8 = int_to_ptr.vmem [resolvable:$true] %s698_s8 }
 0x1da   :  { %v358_v25 = vpop.f32.mrf.mxu2 }
 0x1db   :  { %v387_v26 = vpop.f32.mrf.mxu3  ;;  %v359_v43 = vadd.f32 %v358_v25, %v312_v41 }
 0x1dc   :  { %v388_v44 = vadd.f32 %v387_v26, %v312_v41 }
 0x1e2   :  { %v361_v27 = vpop.f32.mrf.mxu2 }
 0x1e3   :  { %v390_v28 = vpop.f32.mrf.mxu3  ;;  %v362_v40 = vadd.f32 %v361_v27, %v317_v37 }
 0x1e4   :  { %v391_v42 = vadd.f32 %v390_v28, %v317_v37  ;;  %v528_v28 = vpop.permute.xlu2 %527 }
 0x1ea   :  { %v364_v29 = vpop.f32.mrf.mxu2 }
 0x1eb   :  { %v393_v30 = vpop.f32.mrf.mxu3  ;;  %v365_v34 = vadd.f32 %v364_v29, %v322_v32 }
 0x1ec   :  { %v394_v38 = vadd.f32 %v393_v30, %v322_v32  ;;  %v533_v30 = vpop.permute.xlu0 %532 }
 0x1f2   :  { %v367_v33 = vpop.f32.mrf.mxu2 }
 0x1f3   :  { %v368_v35 = vadd.f32 %v367_v33, %v327_v31  ;;  %v396_v36 = vpop.f32.mrf.mxu3 }
 0x1f4   :  { %v397_v39 = vadd.f32 %v396_v36, %v327_v31 }
 0x1f5   :  { %811 = vtanh.f32 %v368_v35 }
 0x1f6   :  { %813 = vtanh.f32 %v397_v39 }
 0x1f7   :  { %815 = vtanh.f32 %v365_v34  ;;  %v538_v34 = vpop.permute.xlu1 %537 }
 0x1f8   :  { %817 = vtanh.f32 %v394_v38 }
 0x1f9   :  { %819 = vtanh.f32 %v362_v40  ;;  %v543_v40 = vpop.permute.xlu2 %542 }
 0x1fa   :  { %821 = vtanh.f32 %v391_v42  ;;  %v630_v42 = vpop.permute.xlu0 %629 }
 0x1fb   :  { %v812_v45 = vpop.eup %811  ;;  %823 = vtanh.f32 %v359_v43 }
 0x1fc   :  { %v814_v46 = vpop.eup %813  ;;  %825 = vtanh.f32 %v388_v44  ;;  %461 = vmatpush.msrb.mxu0 %v812_v45 }
 0x1fd   :  { %v816_v47 = vpop.eup %815  ;;  %490 = vmatpush.msrb.mxu1 %v814_v46 }
 0x1fe   :  { %v818_v48 = vpop.eup %817  ;;  %462 = vmatpush.msrb.mxu0 %v816_v47 }
 0x1ff   :  { %v820_v49 = vpop.eup %819  ;;  %491 = vmatpush.msrb.mxu1 %v818_v48 }
 0x200   :  { %v822_v50 = vpop.eup %821  ;;  %463 = vmatpush.msrb.mxu0 %v820_v49 }
 0x201   :  { %v824_v52 = vpop.eup %823  ;;  %492 = vmatpush.msrb.mxu1 %v822_v50 }
 0x202   :  { %v826_v53 = vpop.eup %825  ;;  %464 = vmatpush.msrb.mxu0 %v824_v52 }
 0x203   :  { %493 = vmatpush.msrb.mxu1 %v826_v53  ;;  %742 = vmatmul.msk.f32.vlgmr.msrb.gmra.mxu0 %vm220_vm4, %v734_v51 }
 0x204   :  { %746 = vmatmul.msk.f32.vlgmr.msrb.gmra.mxu1 %vm220_vm4, %v734_v51  ;;  %v635_v51 = vpop.permute.xlu1 %634 }
 0x20b   :  { %743 = vmatmul.msk.f32.gmra.mxu0 %vm220_vm4, %v735_v54 }
 0x20c   :  { %747 = vmatmul.msk.f32.gmra.mxu1 %vm220_vm4, %v735_v54  ;;  %v640_v54 = vpop.permute.xlu2 %639 }
 0x213   :  { %744 = vmatmul.msk.f32.gmra.mxu0 %vm220_vm4, %v736_v55 }
 0x214   :  { %748 = vmatmul.msk.f32.gmra.mxu1 %vm220_vm4, %v736_v55 }
 0x21b   :  { %745 = vmatmul.msk.f32.gmra.mxu0 %vm220_vm4, %v737_v56 }
 0x21c   :  { %749 = vmatmul.msk.f32.gmra.mxu1 %vm220_vm4, %v737_v56 }
 0x280   :  { %v466_v57 = vpop.f32.mrf.mxu0 }
 0x281   :  { %v495_v58 = vpop.f32.mrf.mxu1  ;;  %v467_v11 = vadd.f32 %v466_v57, %v420_v9 }
 0x282   :  { %v496_v12 = vadd.f32 %v495_v58, %v420_v9 }
 0x288   :  { %v469_v59 = vpop.f32.mrf.mxu0 }
 0x289   :  { %v498_v60 = vpop.f32.mrf.mxu1  ;;  %v470_v8 = vadd.f32 %v469_v59, %v425_v5 }
 0x28a   :  { %v499_v10 = vadd.f32 %v498_v60, %v425_v5 }
 0x290   :  { %v472_v61 = vpop.f32.mrf.mxu0 }
 0x291   :  { %v501_v62 = vpop.f32.mrf.mxu1  ;;  %v473_v2 = vadd.f32 %v472_v61, %v430_v0 }
 0x292   :  { %v502_v6 = vadd.f32 %v501_v62, %v430_v0  ;;  %v645_v62 = vpop.permute.xlu0 %644 }
 0x298   :  { %v475_v1 = vpop.f32.mrf.mxu0 }
 0x299   :  { %v476_v3 = vadd.f32 %v475_v1, %v435_v63  ;;  %v504_v4 = vpop.f32.mrf.mxu1 }
 0x29a   :  { %v505_v7 = vadd.f32 %v504_v4, %v435_v63 }
 0x29b   :  { %827 = vtanh.f32 %v476_v3 }
 0x29c   :  { %829 = vtanh.f32 %v505_v7 }
 0x29d   :  { %831 = vtanh.f32 %v473_v2 }
 0x29e   :  { %833 = vtanh.f32 %v502_v6 }
 0x29f   :  { %835 = vtanh.f32 %v470_v8 }
 0x2a0   :  { %837 = vtanh.f32 %v499_v10 }
 0x2a1   :  { %v828_v13 = vpop.eup %827  ;;  %839 = vtanh.f32 %v467_v11 }
 0x2a2   :  { %v830_v14 = vpop.eup %829  ;;  %841 = vtanh.f32 %v496_v12  ;;  %569 = vmatpush.msrb.mxu2 %v828_v13 }
 0x2a3   :  { %v832_v15 = vpop.eup %831  ;;  %598 = vmatpush.msrb.mxu3 %v830_v14 }
 0x2a4   :  { %v834_v16 = vpop.eup %833  ;;  %570 = vmatpush.msrb.mxu2 %v832_v15  ;;  %v677_v15 = vpop.permute.xlu1 %676 }
 0x2a5   :  { %v836_v17 = vpop.eup %835  ;;  %599 = vmatpush.msrb.mxu3 %v834_v16 }
 0x2a6   :  { %v838_v18 = vpop.eup %837  ;;  %571 = vmatpush.msrb.mxu2 %v836_v17 }
 0x2a7   :  { %v840_v20 = vpop.eup %839  ;;  %600 = vmatpush.msrb.mxu3 %v838_v18  ;;  %v679_v18 = vperm.slane %v677_v15, 0 }
 0x2a8   :  { %v842_v21 = vpop.eup %841  ;;  %572 = vmatpush.msrb.mxu2 %v840_v20 }
 0x2a9   :  { %601 = vmatpush.msrb.mxu3 %v842_v21  ;;  %758 = vmatmul.msk.f32.vlgmr.msrb.gmra.mxu2 %vm220_vm4, %v750_v19  ;;  %v688_v21 = vlaneseq }
 0x2aa   :  { %762 = vmatmul.msk.f32.vlgmr.msrb.gmra.mxu3 %vm220_vm4, %v750_v19 }
 0x2ab   :  { %vm690_vm6 = vcmp.lt.s32.totalorder %v688_v21, 256 }
 0x2b1   :  { %759 = vmatmul.msk.f32.gmra.mxu2 %vm220_vm4, %v751_v22 }
 0x2b2   :  { %763 = vmatmul.msk.f32.gmra.mxu3 %vm220_vm4, %v751_v22 }
 0x2b9   :  { %760 = vmatmul.msk.f32.gmra.mxu2 %vm220_vm4, %v752_v23 }
 0x2ba   :  { %764 = vmatmul.msk.f32.gmra.mxu3 %vm220_vm4, %v752_v23 }
 0x2c1   :  { %761 = vmatmul.msk.f32.gmra.mxu2 %vm220_vm4, %v753_v24 }
 0x2c2   :  { %765 = vmatmul.msk.f32.gmra.mxu3 %vm220_vm4, %v753_v24 }
 0x32c   :  { %v574_v25 = vpop.f32.mrf.mxu2 }
 0x32d   :  { %v603_v26 = vpop.f32.mrf.mxu3  ;;  %v575_v31 = vadd.f32 %v574_v25, %v528_v28 }
 0x32e   :  { %v604_v32 = vadd.f32 %v603_v26, %v528_v28 }
 0x32f   :  { %843 = vtanh.f32 %v575_v31 }
 0x330   :  { %845 = vtanh.f32 %v604_v32 }
 0x334   :  { %v577_v27 = vpop.f32.mrf.mxu2 }
 0x335   :  { %v606_v29 = vpop.f32.mrf.mxu3  ;;  %v578_v33 = vadd.f32 %v577_v27, %v533_v30  ;;  %v844_v41 = vpop.eup %843 }
 0x336   :  { %v607_v35 = vadd.f32 %v606_v29, %v533_v30  ;;  %v846_v43 = vpop.eup %845  ;;  %v647_v56 = vmul.f32 %v844_v41, %v630_v42 }
 0x337   :  { %847 = vtanh.f32 %v578_v33  ;;  %v648_v58 = vmul.f32 %v846_v43, %v630_v42 }
 0x338   :  { %849 = vtanh.f32 %v607_v35 }
 0x33c   :  { %v580_v36 = vpop.f32.mrf.mxu2 }
 0x33d   :  { %v581_v37 = vadd.f32 %v580_v36, %v538_v34  ;;  %v609_v38 = vpop.f32.mrf.mxu3  ;;  %v848_v45 = vpop.eup %847 }
 0x33e   :  { %v610_v39 = vadd.f32 %v609_v38, %v538_v34  ;;  %v850_v48 = vpop.eup %849  ;;  %v649_v53 = vmul.f32 %v848_v45, %v635_v51 }
 0x33f   :  { %851 = vtanh.f32 %v581_v37  ;;  %v650_v55 = vmul.f32 %v850_v48, %v635_v51 }
 0x340   :  { %853 = vtanh.f32 %v610_v39  ;;  %v655_v60 = vadd.f32 %v649_v53, %v647_v56 }
 0x341   :  { %v664_v63 = vadd.f32 %v650_v55, %v648_v58 }
 0x344   :  { %v583_v44 = vpop.f32.mrf.mxu2 }
 0x345   :  { %v584_v46 = vadd.f32 %v583_v44, %v543_v40  ;;  %v612_v47 = vpop.f32.mrf.mxu3  ;;  %v852_v50 = vpop.eup %851 }
 0x346   :  { %v613_v49 = vadd.f32 %v612_v47, %v543_v40  ;;  %v854_v52 = vpop.eup %853  ;;  %v651_v57 = vmul.f32 %v852_v50, %v640_v54 }
 0x347   :  { %855 = vtanh.f32 %v584_v46  ;;  %v652_v59 = vmul.f32 %v854_v52, %v640_v54 }
 0x348   :  { %857 = vtanh.f32 %v613_v49  ;;  %v656_v1 = vadd.f32 %v655_v60, %v651_v57 }
 0x349   :  { %v665_v3 = vadd.f32 %v664_v63, %v652_v59 }
 0x34d   :  { %v856_v61 = vpop.eup %855 }
 0x34e   :  { %v858_v0 = vpop.eup %857  ;;  %v653_v2 = vmul.f32 %v856_v61, %v645_v62 }
 0x34f   :  { %v654_v4 = vmul.f32 %v858_v0, %v645_v62 }
 0x350   :  { %v657_v5 = vadd.f32 %v656_v1, %v653_v2 }
 0x351   :  { %v666_v6 = vadd.f32 %v665_v3, %v654_v4 }
 0x352   :  { %v658_v7 = vrot.slane %v657_v5, 4 }
 0x353   :  { %v667_v8 = vrot.slane %v666_v6, 4 }
 0x354   :  { %v659_v9 = vadd.f32 %v658_v7, %v657_v5 }
 0x355   :  { %v668_v10 = vadd.f32 %v667_v8, %v666_v6 }
 0x356   :  { %v660_v11 = vrot.slane %v659_v9, 2 }
 0x357   :  { %v669_v12 = vrot.slane %v668_v10, 2 }
 0x358   :  { %v661_v13 = vadd.f32 %v660_v11, %v659_v9 }
 0x359   :  { %v670_v14 = vadd.f32 %v669_v12, %v668_v10 }
 0x35a   :  { %v662_v16 = vrot.slane %v661_v13, 1 }
 0x35b   :  { %v671_v17 = vrot.slane %v670_v14, 1 }
 0x35c   :  { %v663_v19 = vadd.f32 %v662_v16, %v661_v13 }
 0x35d   :  { %v672_v20 = vadd.f32 %v671_v17, %v670_v14 }
 0x35e   :  { %v680_v23 = vadd.f32 %v679_v18, %v663_v19 }
 0x35f   :  { %v681_v22 = vadd.f32 %v679_v18, %v672_v20 }
 0x361   :  { %v684_v24 = vrot.slane %v681_v22, 7 }
 0x363   :  { %v686_v25 = vsel %vm685_vm5, %v680_v23, %v684_v24 }
 0x364   :  { %692 = vst.msk [vmem:[#allocation3] sm:$0x3] %vm690_vm6, %v686_v25 }
 0x365   :  { %703 = dma.vmem_to_hbm [thread:$0]  %s699_s8, 32, %s701_s21, [#allocation4]  }
 0x366   :  { %883 = dma.done.wait [#allocation4], 32  }
 0x367   :  { %884 = vsyncadd [#allocation4], 4294967264 }
 0x368   :  { %708 = vsyncpa [#allocation4], 1 }

</bundles_post_ra>
